<compile_context>
chip_gen: v5e
topology: v5e:2x2
jax: 0.10.0
libtpu: 0.0.40
codegen_flags: <defaults>
</compile_context>

<pallas_src>
import functools

import jax
import jax.numpy as jnp
from jax.experimental import pallas as pl
from jax.experimental.pallas import tpu as pltpu


# ----------------------------- helpers -----------------------------

def _round_up(x, m):
    return (x + m - 1) // m * m


def _pad2d(a, rows, cols):
    return jnp.pad(a, ((0, rows - a.shape[0]), (0, cols - a.shape[1])))


# ----------------------------- kernels -----------------------------

def _proto_kernel(n_classes, inv_t, xs_ref, onehot_ref, w_ref, b_ref,
                  protos_t_ref, p_sq_ref):
    """Few-shot prototypes = class means of support embeddings (ClassMean_PT).

    Runs once (small support set), hoisted out of the per-query-tile grid.
    Emits protos already transposed (E_pad, C_pad) plus ||p||^2 (1, C_pad).
    """
    # core_net (dense_layers=0 / rec_layers=0) approximated by time mean-pool;
    # f32-accumulated sum, then one MXU matmul against the (F_pad, E_pad) weight.
    xm = jnp.sum(xs_ref[...].astype(jnp.float32), axis=1) * inv_t   # (Bs_pad, F_pad)
    s_emb = jnp.tanh(
        jnp.dot(xm.astype(w_ref.dtype), w_ref[...],
                preferred_element_type=jnp.float32) + b_ref[...])   # (Bs_pad, E_pad)

    onehot = onehot_ref[...]                                        # (C_pad, Bs_pad)
    counts = jnp.sum(onehot, axis=1, keepdims=True)                 # (C_pad, 1)
    summed = jnp.dot(onehot, s_emb, preferred_element_type=jnp.float32)
    # torch: diag(1/counts) @ summed -> NaN for a *real* class with zero support
    # examples (preserved); padded class rows are forced to count 1 so the
    # padding lanes stay finite and get masked downstream.
    row = jax.lax.broadcasted_iota(jnp.int32, counts.shape, 0)
    protos = summed / jnp.where(row < n_classes, counts, 1.0)       # (C_pad, E_pad)

    pt = protos.T                                                   # (E_pad, C_pad) f32
    p_sq_ref[...] = jnp.sum(pt * pt, axis=0, keepdims=True)         # (1, C_pad) f32
    protos_t_ref[...] = pt.astype(protos_t_ref.dtype)               # (E_pad, C_pad)


def _query_kernel(n_classes, inv_t, emit_dist,
                  xq_ref, w_ref, b_ref, protos_t_ref, p_sq_ref, alpha_ref,
                  probs_ref, *maybe_dist_ref):
    """Per-query-tile: mean-pool + embedding head + ProtoNetMetric + softmax."""
    # TODO(synk): TextEmbeddingClassifier_PT source was not provided; with
    # dense_layers=0 / rec_layers=0 / repeat_encoder=0 the core_net is
    # approximated by a mean-pool over the time axis.
    xm = jnp.sum(xq_ref[...].astype(jnp.float32), axis=1) * inv_t      # (TM, F_pad)
    q = jnp.tanh(
        jnp.dot(xm.astype(w_ref.dtype), w_ref[...],
                preferred_element_type=jnp.float32) + b_ref[...])      # (TM, E_pad) f32

    scale = jnp.square(alpha_ref[0, 0] + 1e-16)

    # ||q - p||^2 = ||q||^2 + ||p||^2 - 2 q.p ; norms in f32, cross term on MXU.
    q_sq = jnp.sum(q * q, axis=-1, keepdims=True)                      # (TM, 1)
    qp = jnp.dot(q.astype(protos_t_ref.dtype), protos_t_ref[...],
                 preferred_element_type=jnp.float32)                   # (TM, C_pad)
    dist = scale * jnp.maximum(q_sq + p_sq_ref[...] - 2.0 * qp, 0.0)
    if emit_dist:
        maybe_dist_ref[0][...] = dist

    # Softmax(dim=1)(exp(-dist)). z = exp(-dist) in (0,1] so exp(z) <= e: the
    # row-max subtraction is unnecessary; padded class lanes are masked to 0.
    col = jax.lax.broadcasted_iota(jnp.int32, dist.shape, 1)
    ez = jnp.where(col < n_classes, jnp.exp(jnp.exp(-dist)), 0.0)
    denom = jnp.sum(ez, axis=1, keepdims=True)
    inv = pl.reciprocal(denom, approx=True)                            # EUP rcp
    inv = inv * (2.0 - denom * inv)                                    # Newton -> ~f32
    probs_ref[...] = ez * inv


# ------------------------------ JAX glue ----------------------------------

def init_params(key, features, embedding_dim, n_classes):
    # dense_layers=0, rec_layers=0 => last_in_features = features
    k_w, k_b, k_p = jax.random.split(key, 3)
    bound = 1.0 / jnp.sqrt(jnp.float32(features))
    w = jax.random.uniform(k_w, (features, embedding_dim), jnp.float32, -bound, bound)
    b = jax.random.uniform(k_b, (1, embedding_dim), jnp.float32, -bound, bound)
    prototypes = jax.random.uniform(k_p, (n_classes, embedding_dim), jnp.float32)
    alpha = jnp.ones((1, 1), jnp.float32)                      # ProtoNetMetric_PT.alpha
    return dict(w=w, b=b, prototypes=prototypes, alpha=alpha)


def prepare_protonet(params, times, matmul_dtype=jnp.bfloat16):
    """One-time prep (cache across forward calls): padded/cast weight + bias and
    trained-prototype tables (protos^T, ||p||^2) for prediction mode."""
    f, e = params["w"].shape
    n_classes = params["prototypes"].shape[0]
    f_pad = _round_up(f, 128)
    e_pad = _round_up(e, 128)
    c_pad = _round_up(n_classes, 128)

    w_pad = _pad2d(params["w"].astype(jnp.float32), f_pad, e_pad).astype(matmul_dtype)
    b_pad = _pad2d(params["b"].astype(jnp.float32), 1, e_pad)

    protos = _pad2d(params["prototypes"].astype(jnp.float32), c_pad, e_pad)
    protos_t = protos.T.astype(matmul_dtype)                    # (E_pad, C_pad)
    p_sq = jnp.sum(protos * protos, axis=1, keepdims=True).T    # (1, C_pad) f32

    return dict(w=w_pad, b=b_pad, alpha=params["alpha"].astype(jnp.float32),
                protos_t=protos_t, p_sq=p_sq,
                features=f, embedding_dim=e, n_classes=n_classes, times=times,
                f_pad=f_pad, e_pad=e_pad, c_pad=c_pad, mm_dtype=matmul_dtype)


def protonet_forward(prepared, input_q, classes_s=None, input_s=None,
                     prediction_mode=True, block_rows=None):
    t = prepared["times"]
    f = prepared["features"]
    f_pad, e_pad, c_pad = prepared["f_pad"], prepared["e_pad"], prepared["c_pad"]
    n_classes = prepared["n_classes"]
    mm_dtype = prepared["mm_dtype"]
    inv_t = 1.0 / float(t)

    bq = input_q.shape[0]
    assert input_q.shape[1] == t and input_q.shape[2] == f

    vmem = pl.BlockSpec(memory_space=pltpu.MemorySpace.VMEM)
    smem = pl.BlockSpec(memory_space=pltpu.MemorySpace.SMEM)

    # Per-generation query tile: v5e MXU M saturates at 128, v6e/v7x at 256.
    if block_rows is None:
        try:
            kind = jax.devices()[0].device_kind.lower()
        except Exception:  # pragma: no cover
            kind = ""
        block_rows = 128 if "v5" in kind else 256
    rows = _round_up(bq, 8)
    tm = min(block_rows, rows)
    # Ensure >= 2 grid steps when the batch allows so the "parallel" axis
    # actually shards across v7x's two TensorCores.
    if rows >= 16 and rows // tm < 2:
        tm = _round_up((rows + 1) // 2, 8)
    bq_pad = _round_up(bq, tm)

    xq = jnp.pad(input_q.astype(jnp.float32),
                 ((0, bq_pad - bq), (0, 0), (0, f_pad - f))).astype(mm_dtype)

    # Prototypes (transposed for the MXU cross term) + squared norms.
    if input_s is None or classes_s is None:
        protos_t, p_sq = prepared["protos_t"], prepared["p_sq"]
    else:
        bs = input_s.shape[0]
        bs_pad = _round_up(bs, 8)
        xs = jnp.pad(input_s.astype(jnp.float32),
                     ((0, bs_pad - bs), (0, 0), (0, f_pad - f))).astype(mm_dtype)
        onehot = jax.nn.one_hot(classes_s.astype(jnp.int32), n_classes,
                                dtype=jnp.float32).T             # (C, Bs)
        onehot = _pad2d(onehot, c_pad, bs_pad)
        protos_t, p_sq = pl.pallas_call(
            functools.partial(_proto_kernel, n_classes, inv_t),
            out_shape=(jax.ShapeDtypeStruct((e_pad, c_pad), mm_dtype),
                       jax.ShapeDtypeStruct((1, c_pad), jnp.float32)),
            in_specs=[vmem] * 4,
            out_specs=(vmem, vmem),
        )(xs, onehot, prepared["w"], prepared["b"])

    grid = (bq_pad // tm,)
    emit_dist = not prediction_mode
    kernel = functools.partial(_query_kernel, n_classes, inv_t, emit_dist)

    out_tile = pl.BlockSpec((tm, c_pad), lambda i: (i, 0))
    if emit_dist:
        out_shape = (jax.ShapeDtypeStruct((bq_pad, c_pad), jnp.float32),
                     jax.ShapeDtypeStruct((bq_pad, c_pad), jnp.float32))
        out_specs = (out_tile, out_tile)
    else:
        out_shape = jax.ShapeDtypeStruct((bq_pad, c_pad), jnp.float32)
        out_specs = out_tile

    outs = pl.pallas_call(
        kernel,
        out_shape=out_shape,
        grid=grid,
        in_specs=[
            pl.BlockSpec((tm, t, f_pad), lambda i: (i, 0, 0)),  # streamed query tile
            vmem,   # weight (F_pad, E_pad) — resident, single copy
            vmem,   # bias (1, E_pad)
            vmem,   # protos^T (E_pad, C_pad)
            vmem,   # ||p||^2 (1, C_pad)
            smem,   # alpha scalar
        ],
        out_specs=out_specs,
        compiler_params=pltpu.CompilerParams(
            dimension_semantics=("parallel",),
            # v5e scoped default is 16 MiB; v7x physical VMEM is 64 MiB — if the
            # resident weight + double-buffered tiles outgrow this, halve tm.
            vmem_limit_bytes=32 * 1024 * 1024),
    )(xq, prepared["w"], prepared["b"], protos_t, p_sq, prepared["alpha"])

    if emit_dist:
        probs_pad, dist_pad = outs
        return probs_pad[:bq, :n_classes], dist_pad[:bq, :n_classes]
    return outs[:bq, :n_classes]


# --------------------------- pure-JAX reference ----------------------------

def _reference(params, input_q, classes_s=None, input_s=None):
    def embed(x):
        return jnp.tanh(jnp.mean(x, axis=1) @ params["w"] + params["b"])
    q_emb = embed(input_q)
    if input_s is None or classes_s is None:
        protos = params["prototypes"]
    else:
        s_emb = embed(input_s)
        n_classes = params["prototypes"].shape[0]
        onehot = jax.nn.one_hot(classes_s.astype(jnp.int32), n_classes,
                                dtype=jnp.float32).T
        protos = (onehot @ s_emb) / jnp.sum(onehot, axis=1, keepdims=True)
    scale = jnp.square(params["alpha"][0, 0] + 1e-16)
    dist = scale * jnp.sum(
        jnp.square(q_emb[:, None, :] - protos[None, :, :]), axis=-1)
    probs = jax.nn.softmax(jnp.exp(-dist), axis=1)
    return probs, dist


# ----------------------------------- main ----------------------------------

if __name__ == "__main__":
    features, times, embedding_dim = 32, 8, 16
    n_classes = 4
    Bq, Bs = 16, 8

    key = jax.random.PRNGKey(0)
    k_params, k_q, k_s = jax.random.split(key, 3)
    params = init_params(k_params, features, embedding_dim, n_classes)

    input_q = jax.random.normal(k_q, (Bq, times, features), jnp.float32)
    input_s = jax.random.normal(k_s, (Bs, times, features), jnp.float32)
    classes_s = jnp.array([0, 1, 2, 3, 0, 1, 2, 3], jnp.int32)

    ref_probs_pred, ref_dist_pred = _reference(params, input_q)
    ref_probs_fs, ref_dist_fs = _reference(params, input_q, classes_s, input_s)

    # ---------- f32 matmul path (tight correctness check) ----------
    prep32 = prepare_protonet(params, times, matmul_dtype=jnp.float32)
    probs_only = protonet_forward(prep32, input_q)               # prediction mode
    probs_pred, dist_pred = protonet_forward(prep32, input_q, prediction_mode=False)
    probs_fs, dist_fs = protonet_forward(prep32, input_q, classes_s=classes_s,
                                         input_s=input_s, prediction_mode=False)
    jax.block_until_ready((probs_only, probs_pred, dist_pred, probs_fs, dist_fs))

    assert jnp.allclose(probs_only, probs_pred, atol=1e-6), "mode mismatch"
    assert jnp.allclose(probs_pred, ref_probs_pred, atol=1e-4), "predict probs"
    assert jnp.allclose(dist_pred, ref_dist_pred, atol=1e-3, rtol=1e-4), "predict dist"
    assert jnp.allclose(probs_fs, ref_probs_fs, atol=1e-4), "few-shot probs"
    assert jnp.allclose(dist_fs, ref_dist_fs, atol=1e-3, rtol=1e-4), "few-shot dist"
    assert jnp.allclose(jnp.sum(probs_pred, axis=1), 1.0, atol=1e-4)
    assert jnp.allclose(jnp.sum(probs_fs, axis=1), 1.0, atol=1e-4)

    # ---------- bf16 MXU-operand path (native on v5e/v6e/v7x, f32 accumulate) ----------
    prep16 = prepare_protonet(params, times, matmul_dtype=jnp.bfloat16)
    probs_pred16, dist_pred16 = protonet_forward(prep16, input_q, prediction_mode=False)
    probs_fs16, dist_fs16 = protonet_forward(prep16, input_q, classes_s=classes_s,
                                             input_s=input_s, prediction_mode=False)
    jax.block_until_ready((probs_pred16, dist_pred16, probs_fs16, dist_fs16))

    assert jnp.allclose(probs_pred16, ref_probs_pred, atol=5e-2), "bf16 predict probs"
    assert jnp.allclose(dist_pred16, ref_dist_pred, atol=2.5e-1, rtol=1e-1), "bf16 dist"
    assert jnp.allclose(probs_fs16, ref_probs_fs, atol=5e-2), "bf16 few-shot probs"
    assert jnp.allclose(dist_fs16, ref_dist_fs, atol=2.5e-1, rtol=1e-1), "bf16 fs dist"
    assert jnp.allclose(jnp.sum(probs_pred16, axis=1), 1.0, atol=1e-3)

    print("KERNEL_OK")
</pallas_src>

<mosaic_0001>
module attributes {stable_mosaic.version = 11 : i64} {
  func.func @_query_kernel(%arg0: i32, %arg1: memref<8x8x128xf32, #tpu.memory_space<vmem>>, %arg2: memref<128x128xf32, #tpu.memory_space<vmem>>, %arg3: memref<1x128xf32, #tpu.memory_space<vmem>>, %arg4: memref<128x128xf32, #tpu.memory_space<vmem>>, %arg5: memref<1x128xf32, #tpu.memory_space<vmem>>, %arg6: memref<1x1xf32, #tpu.memory_space<smem>>, %arg7: memref<8x128xf32, #tpu.memory_space<vmem>>) attributes {dimension_semantics = [#tpu.dimension_semantics<parallel>], iteration_bounds = array<i64: 2>, scalar_prefetch = 0 : i64, scratch_operands = 0 : i64, tpu.core_type = #tpu.core_type<tc>, window_params = [{transform_indices = @transform_0, window_bounds = array<i64: 8, 8, 128>}, {pipeline_mode = #tpu.pipeline_mode<synchronous>, transform_indices = @transform_1, window_bounds = array<i64: 128, 128>}, {pipeline_mode = #tpu.pipeline_mode<synchronous>, transform_indices = @transform_2, window_bounds = array<i64: 1, 128>}, {pipeline_mode = #tpu.pipeline_mode<synchronous>, transform_indices = @transform_3, window_bounds = array<i64: 128, 128>}, {pipeline_mode = #tpu.pipeline_mode<synchronous>, transform_indices = @transform_4, window_bounds = array<i64: 1, 128>}, {transform_indices = @transform_5, window_bounds = array<i64: 1, 1>}, {transform_indices = @transform_6, window_bounds = array<i64: 8, 128>}]} {
    %c0 = arith.constant 0 : index
    %c0_0 = arith.constant 0 : index
    %c0_1 = arith.constant 0 : index
    %0 = vector.load %arg1[%c0, %c0_0, %c0_1] : memref<8x8x128xf32, #tpu.memory_space<vmem>>, vector<8x8x128xf32>
    %cst = arith.constant dense<0.000000e+00> : vector<8x128xf32>
    %1 = vector.multi_reduction <add>, %0, %cst [1] : vector<8x8x128xf32> to vector<8x128xf32>
    %cst_2 = arith.constant 1.250000e-01 : f32
    %2 = vector.broadcast %cst_2 : f32 to vector<8x128xf32>
    %3 = arith.mulf %1, %2 : vector<8x128xf32>
    %c0_3 = arith.constant 0 : index
    %c0_4 = arith.constant 0 : index
    %4 = vector.load %arg2[%c0_3, %c0_4] : memref<128x128xf32, #tpu.memory_space<vmem>>, vector<128x128xf32>
    %cst_5 = arith.constant dense<0.000000e+00> : vector<8x128xf32>
    %5 = tpu.matmul %3, %4, %cst_5 {dimension_numbers = #tpu.dot_dimension_numbers<[1], [0], [0], [1], [0, 0, 1, 1], [], []>} : vector<8x128xf32>, vector<128x128xf32>, vector<8x128xf32> -> vector<8x128xf32>
    %c0_6 = arith.constant 0 : index
    %c0_7 = arith.constant 0 : index
    %6 = vector.load %arg3[%c0_6, %c0_7] : memref<1x128xf32, #tpu.memory_space<vmem>>, vector<1x128xf32>
    %7 = vector.broadcast %6 : vector<1x128xf32> to vector<8x128xf32>
    %8 = arith.addf %5, %7 : vector<8x128xf32>
    %9 = math.tanh %8 : vector<8x128xf32>
    %c0_8 = arith.constant 0 : index
    %c0_9 = arith.constant 0 : index
    %10 = memref.load %arg6[%c0_8, %c0_9] : memref<1x1xf32, #tpu.memory_space<smem>>
    %cst_10 = arith.constant 1.000000e-16 : f32
    %11 = arith.addf %10, %cst_10 : f32
    %12 = arith.mulf %11, %11 : f32
    %13 = arith.mulf %9, %9 : vector<8x128xf32>
    %cst_11 = arith.constant dense<0.000000e+00> : vector<8xf32>
    %14 = vector.multi_reduction <add>, %13, %cst_11 [1] : vector<8x128xf32> to vector<8xf32>
    %15 = vector.shape_cast %14 : vector<8xf32> to vector<8x1xf32>
    %c0_12 = arith.constant 0 : index
    %c0_13 = arith.constant 0 : index
    %16 = vector.load %arg4[%c0_12, %c0_13] : memref<128x128xf32, #tpu.memory_space<vmem>>, vector<128x128xf32>
    %cst_14 = arith.constant dense<0.000000e+00> : vector<8x128xf32>
    %17 = tpu.matmul %9, %16, %cst_14 {dimension_numbers = #tpu.dot_dimension_numbers<[1], [0], [0], [1], [0, 0, 1, 1], [], []>} : vector<8x128xf32>, vector<128x128xf32>, vector<8x128xf32> -> vector<8x128xf32>
    %c0_15 = arith.constant 0 : index
    %c0_16 = arith.constant 0 : index
    %18 = vector.load %arg5[%c0_15, %c0_16] : memref<1x128xf32, #tpu.memory_space<vmem>>, vector<1x128xf32>
    %19 = vector.broadcast %15 : vector<8x1xf32> to vector<8x128xf32>
    %20 = vector.broadcast %18 : vector<1x128xf32> to vector<8x128xf32>
    %21 = arith.addf %19, %20 : vector<8x128xf32>
    %cst_17 = arith.constant 2.000000e+00 : f32
    %22 = vector.broadcast %cst_17 : f32 to vector<8x128xf32>
    %23 = arith.mulf %22, %17 : vector<8x128xf32>
    %24 = arith.subf %21, %23 : vector<8x128xf32>
    %cst_18 = arith.constant 0.000000e+00 : f32
    %25 = vector.broadcast %cst_18 : f32 to vector<8x128xf32>
    %26 = arith.maximumf %24, %25 : vector<8x128xf32>
    %27 = vector.broadcast %12 : f32 to vector<8x128xf32>
    %28 = arith.mulf %27, %26 : vector<8x128xf32>
    %29 = tpu.iota {dimensions = array<i32: 1>} : vector<8x128xi32>
    %c4_i32 = arith.constant 4 : i32
    %30 = vector.broadcast %c4_i32 : i32 to vector<8x128xi32>
    %31 = arith.cmpi slt, %29, %30 : vector<8x128xi32>
    %cst_19 = arith.constant 0.000000e+00 : f32
    %32 = vector.broadcast %cst_19 : f32 to vector<8x128xf32>
    %33 = arith.subf %32, %28 : vector<8x128xf32>
    %34 = math.exp %33 : vector<8x128xf32>
    %35 = math.exp %34 : vector<8x128xf32>
    %cst_20 = arith.constant 0.000000e+00 : f32
    %36 = vector.broadcast %cst_20 : f32 to vector<8x128xf32>
    %37 = arith.select %31, %35, %36 : vector<8x128xi1>, vector<8x128xf32>
    %cst_21 = arith.constant dense<0.000000e+00> : vector<8xf32>
    %38 = vector.multi_reduction <add>, %37, %cst_21 [1] : vector<8x128xf32> to vector<8xf32>
    %39 = vector.shape_cast %38 : vector<8xf32> to vector<8x1xf32>
    %40 = tpu.reciprocal %39 {approx = true} : vector<8x1xf32> -> vector<8x1xf32>
    %41 = arith.mulf %39, %40 : vector<8x1xf32>
    %cst_22 = arith.constant 2.000000e+00 : f32
    %42 = vector.broadcast %cst_22 : f32 to vector<8x1xf32>
    %43 = arith.subf %42, %41 : vector<8x1xf32>
    %44 = arith.mulf %40, %43 : vector<8x1xf32>
    %45 = vector.broadcast %44 : vector<8x1xf32> to vector<8x128xf32>
    %46 = arith.mulf %37, %45 : vector<8x128xf32>
    %c0_23 = arith.constant 0 : index
    %c0_24 = arith.constant 0 : index
    %47 = vector.load %arg7[%c0_23, %c0_24] : memref<8x128xf32, #tpu.memory_space<vmem>>, vector<8x128xf32>
    tpu.vector_store %arg7[%c0_23, %c0_24], %46 {strides = array<i32>} : memref<8x128xf32, #tpu.memory_space<vmem>>, vector<8x128xf32>,
    return
  }
  func.func @transform_0(%arg0: i32) -> (i32, i32, i32) {
    %c0_i32 = arith.constant 0 : i32
    %c0_i32_0 = arith.constant 0 : i32
    %c0_i32_1 = arith.constant 0 : i32
    return %arg0, %c0_i32, %c0_i32_0 : i32, i32, i32
  }
  func.func @transform_1(%arg0: i32) -> (i32, i32) {
    %c0_i32 = arith.constant 0 : i32
    %c0_i32_0 = arith.constant 0 : i32
    %c0_i32_1 = arith.constant 0 : i32
    return %c0_i32, %c0_i32_0 : i32, i32
  }
  func.func @transform_2(%arg0: i32) -> (i32, i32) {
    %c0_i32 = arith.constant 0 : i32
    %c0_i32_0 = arith.constant 0 : i32
    %c0_i32_1 = arith.constant 0 : i32
    return %c0_i32, %c0_i32_0 : i32, i32
  }
  func.func @transform_3(%arg0: i32) -> (i32, i32) {
    %c0_i32 = arith.constant 0 : i32
    %c0_i32_0 = arith.constant 0 : i32
    %c0_i32_1 = arith.constant 0 : i32
    return %c0_i32, %c0_i32_0 : i32, i32
  }
  func.func @transform_4(%arg0: i32) -> (i32, i32) {
    %c0_i32 = arith.constant 0 : i32
    %c0_i32_0 = arith.constant 0 : i32
    %c0_i32_1 = arith.constant 0 : i32
    return %c0_i32, %c0_i32_0 : i32, i32
  }
  func.func @transform_5(%arg0: i32) -> (i32, i32) {
    %c0_i32 = arith.constant 0 : i32
    %c0_i32_0 = arith.constant 0 : i32
    %c0_i32_1 = arith.constant 0 : i32
    return %c0_i32, %c0_i32_0 : i32, i32
  }
  func.func @transform_6(%arg0: i32) -> (i32, i32) {
    %c0_i32 = arith.constant 0 : i32
    %c0_i32_0 = arith.constant 0 : i32
    return %arg0, %c0_i32 : i32, i32
  }
}

</mosaic_0001>

<bundles_post_ra>
// kernel: tpu_custom_call.1
= control target key start
LH: loop header
LB: loop body
LE: loop exit
PB: predicated region body
PF: predicated region fallthrough
CT: control target
= control target key end

     0   :  { %s1069_s0 = inlined_call_operand.hbm [shape: f32[16,8,128], index: 0, kind: input, shape index: {}]   ;;  %s1070_s1 = inlined_call_operand.hbm [shape: f32[128,128], index: 1, kind: input, shape index: {}]   ;;  %s1071_s2 = inlined_call_operand.vmem [shape: f32[1,128], index: 2, kind: input, shape index: {}]   ;;  %s1072_s3 = inlined_call_operand.hbm [shape: f32[128,128], index: 3, kind: input, shape index: {}]   ;;  %s1073_s4 = inlined_call_operand.vmem [shape: f32[1,128], index: 4, kind: input, shape index: {}]   ;;  %s1074_s5 = inlined_call_operand.<no memory space> [shape: f32[1,1], index: 5, kind: input, shape index: {}]   ;;  %s1075_s6 = inlined_call_operand.hbm [shape: f32[16,128], index: 6, kind: output, shape index: {}]  }
   0x1   :  { %11 = sst [smem:[#allocation2]] %s1074_s5 }
   0x2   :  { %12 = vsyncpa [#allocation4], 0 }
   0x3   :  { %14 = vsyncpa [#allocation4 + $0x1], 0 }
   0x4   :  { %15 = vsyncpa [#allocation7], 0 }
   0x5   :  { %16 = vsyncpa [#allocation5], 0 }
   0x6   :  { %18 = vsyncpa [#allocation5 + $0x1], 0  ;;  %s910_s23 = smov 0   ;;  %s912_s24 = smov 0  }
   0x7   :  { %s914_s25 = smov 0   ;;  %s916_s26 = smov 0  }
   0x8 LB: > { %s931_s5 = sadd.s32 4294967295, %s866_s26   ;;  %s609_s27 = sadd.s32 4294967294, %s866_s26   ;;  %s866_s26 = sphi %s916_s26, %s1087_s26   ;;  %s862_s25 = sphi %s914_s25, %s1086_s25   ;;  %s858_s24 = sphi %s912_s24, %s1085_s24   ;;  %s854_s23 = sphi %s910_s23, %s1084_s23  }
   0x9   : > { %p44_p0 = scmp.ne.s32.totalorder %s858_s24, %s854_s23  ;;  %p45_p1 = scmp.eq.s32.totalorder %s931_s5, 0 }
   0xa   : > { %p173_p2 = scmp.eq.s32.totalorder %s931_s5, 1  ;;  %p179_p3 = scmp.eq.s32.totalorder %s609_s27, 1 }
   0xb   : > { %p940_p4 = por %p45_p1, %p44_p0  ;;  %p610_p5 = scmp.ge.s32.totalorder %s866_s26, 1 }
   0xc   : > { %p945_p6 = por %p179_p3, %p44_p0  ;;  %p186_p7 = scmp.lt.s32.totalorder %s866_s26, 3 }
   0xd   : > { %s197_s8 = sshll.u32 %s1070_s1, 4  ;;  %s868_s10 = smov [#allocation6]   ;;  %s198_s8 = int_to_ptr.hbm [resolvable:$true] %s197_s8 }
   0xe   : > { %p953_p8 = pnand %p610_p5, %p186_p7  ;;  %s199_s11 = sshll.u32 %s868_s10, 4  ;;  %s200_s11 = int_to_ptr.vmem [resolvable:$true] %s199_s11 }
   0xf   : > { %s214_s14 = sshll.u32 %s1072_s3, 4  ;;  %s1076_s15 = smov 128   ;;  %s215_s14 = int_to_ptr.hbm [resolvable:$true] %s214_s14 }
  0x10   : > { %p639_p9 = pneg %p953_p8  ;;  %s870_s16 = smov 8  }
  0x11   : > { %s871_s17 = smov [#allocation8]   ;;  %s972_s19 = sadd.s32 1, %s866_s26  }
  0x12   : > { %p640_p10 = pnand %p639_p9, %p45_p1  ;;  %s216_s18 = sshll.u32 %s871_s17, 4  ;;  %s217_s18 = int_to_ptr.vmem [resolvable:$true] %s216_s18 }
  0x13   : > { %s31_s20 = sadd.s32 1, %s862_s25  ;;  %s28_s21 = ssub.s32 %s866_s26, %s972_s19 }
  0x14   : > { %642 = dma.hbm_to_vmem [thread:$0]  (!%p640_p10), %s198_s8, 2048, %s200_s11, [#allocation7], %s1076_s15, %s1076_s15, %s870_s16  }
  0x15   : > { %645 = dma.hbm_to_vmem [thread:$0]  (!%p640_p10), %s215_s14, 2048, %s217_s18, [#allocation7], %s1076_s15, %s1076_s15, %s870_s16  }
  0x16   : > { %p38_p12 = scmp.ne.s32.totalorder %s862_s25, %s858_s24  ;;  %p29_p13 = scmp.eq.s32.totalorder %s28_s21, 0 }
  0x17   : > { %p39_p0 = scmp.eq.s32.totalorder %s866_s26, 0  ;;  %p656_p5 = scmp.lt.s32.totalorder %s866_s26, 2 }
  0x18   : > { %p982_p3 = por %p173_p2, %p38_p12  ;;  %s236_s30 = sand.u32 1, %s862_s25  }
  0x19   : > { %s988_s27 = scalar_select %p29_p13, %s862_s25, %s31_s20  }
  0x1a   : > { %p40_p7 = por %p39_p0, %p38_p12  ;;  %s614_s7 = sshll.u32 %s236_s30, 6 }
  0x1b   : > { %s626_s8 = sshll.u32 %s866_s26, 6  ;;  %s240_s13 = scalar_lea.vmem [#allocation3], %s614_s7 }
  0x1c   : > { %s245_s12 = scalar_lea.hbm %s1069_s0, %s626_s8  ;;  %s248_s14 = sshll.u32 %s240_s13, 4  ;;  %s249_s14 = int_to_ptr.vmem [resolvable:$true] %s248_s14 }
  0x1d   : > { %s246_s17 = sshll.u32 %s245_s12, 4  ;;  %p995_p2 = pnand %p656_p5, %p40_p7  ;;  %s247_s17 = int_to_ptr.hbm [resolvable:$true] %s246_s17 }
  0x1e   : > { %s237_s20 = scalar_lea.sflag [#allocation4], %s236_s30  ;;  %s766_s21 = sshra.s32 %s247_s17, 4  ;;  %s767_s21 = int_to_ptr.hbm [resolvable:$true] %s766_s21 }
  0x1f   : > { %s768_s15 = scalar_lea.hbm %s767_s21, 64  ;;  %p770_p10 = pneg %p995_p2 }
  0x20   : > { %p769_p9 = scmp.ne.s32.totalorder %s767_s21, %s768_s15  ;;  %s773_s10 = scalar_lea.hbm %s1069_s0, 128 }
  0x21   : > { %p774_p0 = scmp.lt.s32.totalorder %s767_s21, %s1069_s0  ;;  %p775_p5 = scmp.lt.s32.totalorder %s773_s10, %s768_s15 }
  0x22   : > { %p771_p12 = pnand %p770_p10, %p769_p9 }
  0x23   : > { %p776_p7 = por %p775_p5, %p774_p0 }
  0x24   : > { %p772_p13 = pneg %p771_p12 }
  0x26   : > { %p777_p11 = pnand %p776_p7, %p772_p13 }
  0x28   : > { %780 = shalt.err (!%p777_p11)
}
  0x29   : > { %s1082_s30 = smov 128   ;;  %260 = sbr.rel (%p953_p8) target bundleno = 505 (0x1f9), region = 44 }
  0x2a   : > { %649 = dma.hbm_to_vmem [thread:$0]  (!%p995_p2), %s247_s17, 1024, %s249_s14, %s237_s20, %s1082_s30, %s1082_s30, %s870_s16  }
  0x2b   : > { %s1015_s13 = sand.u32 (!%p953_p8), 1, %s858_s24  }
  0x2c   : > { %s618_s21 = sshll.u32 (!%p953_p8), %s1015_s13, 6  ;;  %s263_s15 = scalar_lea.sflag (!%p953_p8), [#allocation4], %s1015_s13 }
  0x2d   : > { %s266_s8 = scalar_lea.vmem (!%p953_p8), [#allocation3], %s618_s21 }
  0x2e   : > { %841 = dma.done.wait (%p940_p4), %s263_s15, 1024  }
  0x2f   : > { %843 = vsyncadd (%p940_p4), %s263_s15, 4294966272 }
  0x30   : > { %845 = dma.done.wait (%p45_p1), [#allocation7], 4096  }
  0x31   : > { %847 = vsyncadd (%p45_p1), [#allocation7], 4294963200  ;;  %v386_v0 = vld [vmem:[#allocation6 + $0x78] sm:$0xff]  ;;  %v385_v1 = vld [vmem:[#allocation6 + $0x70] sm:$0xff]  ;;  %vm399_vm0 = vcmask 1041409   ;;  %vm401_vm1 = vcmask 1042434  }
  0x32   : > { %414 = vmatpush.msra.mxu0 %v386_v0  ;;  %v384_v2 = vld [vmem:[#allocation6 + $0x68] sm:$0xff]  ;;  %v383_v3 = vld [vmem:[#allocation6 + $0x60] sm:$0xff]  ;;  %v382_v4 = vld [vmem:[#allocation6 + $0x58] sm:$0xff]  ;;  %vm403_vm2 = vcmask 1043459   ;;  %vm405_vm3 = vcmask 1044484   ;;  %vm407_vm4 = vcmask 1045509  }
  0x33   : > { %v307_v5 = vld [vmem:[%s266_s8] sm:$0xff]  ;;  %v308_v6 = vld [vmem:[%s266_s8 + $0x8] sm:$0xff]  ;;  %v309_v7 = vld [vmem:[%s266_s8 + $0x10] sm:$0xff]  ;;  %vm409_vm5 = vcmask 1046534   ;;  %vm411_vm6 = vcmask 1047559   ;;  %s435_s16 = sld [smem:[#allocation2]] }
  0x34   : > { %415 = vmatpush.msra.mxu0 %v385_v1  ;;  %v310_v8 = vld [vmem:[%s266_s8 + $0x18] sm:$0xff]  ;;  %v311_v9 = vld [vmem:[%s266_s8 + $0x20] sm:$0xff]  ;;  %v315_v10 = vrot.slane %v307_v5, 4  ;;  %v321_v11 = vrot.slane %v308_v6, 4  ;;  %v312_v12 = vld [vmem:[%s266_s8 + $0x28] sm:$0xff]  ;;  %v327_v15 = vrot.slane %v309_v7, 4 }
  0x35   : > { %v313_v13 = vld [vmem:[%s266_s8 + $0x30] sm:$0xff]  ;;  %v314_v14 = vld [vmem:[%s266_s8 + $0x38] sm:$0xff]  ;;  %v333_v16 = vrot.slane %v310_v8, 4  ;;  %v339_v17 = vrot.slane %v311_v9, 4  ;;  %v345_v21 = vrot.slane %v312_v12, 4  ;;  %v380_v29 = vld [vmem:[#allocation6 + $0x48] sm:$0xff] }
  0x36   : > { %416 = vmatpush.msra.mxu0 %v384_v2  ;;  %v381_v18 = vld [vmem:[#allocation6 + $0x50] sm:$0xff]  ;;  %v316_v19 = vadd.f32 %v315_v10, %v307_v5  ;;  %v322_v20 = vadd.f32 %v321_v11, %v308_v6  ;;  %v351_v22 = vrot.slane %v313_v13, 4  ;;  %v456_v23 = vld [vmem:[#allocation8 + $0x78] sm:$0xff]  ;;  %v328_v25 = vadd.f32 %v327_v15, %v309_v7  ;;  %v454_v34 = vld [vmem:[#allocation8 + $0x68] sm:$0xff]  ;;  %s621_s7 = sshll.u32 %s1015_s13, 3  ;;  %s623_s10 = sshll.u32 %s931_s5, 3 }
  0x37   : > { %v455_v24 = vld [vmem:[#allocation8 + $0x70] sm:$0xff]  ;;  %v334_v26 = vadd.f32 %v333_v16, %v310_v8  ;;  %v340_v27 = vadd.f32 %v339_v17, %v311_v9  ;;  %v357_v28 = vrot.slane %v314_v14, 4  ;;  %457 = vmatpush.msra.mxu1 %v456_v23  ;;  %v346_v32 = vadd.f32 %v345_v21, %v312_v12  ;;  %v379_v39 = vld [vmem:[#allocation6 + $0x40] sm:$0xff]  ;;  %v378_v49 = vld [vmem:[#allocation6 + $0x38] sm:$0xff]  ;;  %s515_s30 = scalar_lea.hbm %s1075_s6, %s623_s10  ;;  %s305_s21 = scalar_lea.vmem [#allocation9], %s621_s7 }
  0x38   : > { %417 = vmatpush.msra.mxu0 %v383_v3  ;;  %v317_v30 = vrot.slane %v316_v19, 2  ;;  %v323_v31 = vrot.slane %v322_v20, 2  ;;  %v352_v33 = vadd.f32 %v351_v22, %v313_v13  ;;  %v329_v35 = vrot.slane %v328_v25, 2  ;;  %v453_v44 = vld [vmem:[#allocation8 + $0x60] sm:$0xff]  ;;  %v452_v54 = vld [vmem:[#allocation8 + $0x58] sm:$0xff]  ;;  %v377_v59 = vld [vmem:[#allocation6 + $0x30] sm:$0xff] }
  0x39   : > { %v335_v36 = vrot.slane %v334_v26, 2  ;;  %v341_v37 = vrot.slane %v340_v27, 2  ;;  %v358_v38 = vadd.f32 %v357_v28, %v314_v14  ;;  %458 = vmatpush.msra.mxu1 %v455_v24  ;;  %v347_v42 = vrot.slane %v346_v32, 2  ;;  %v451_v0 = vld [vmem:[#allocation8 + $0x50] sm:$0xff]  ;;  %v376_v5 = vld [vmem:[#allocation6 + $0x28] sm:$0xff]  ;;  %v375_v14 = vld [vmem:[#allocation6 + $0x20] sm:$0xff] }
  0x3a   : > { %418 = vmatpush.msra.mxu0 %v382_v4  ;;  %v318_v40 = vadd.f32 %v317_v30, %v316_v19  ;;  %v324_v41 = vadd.f32 %v323_v31, %v322_v20  ;;  %v353_v43 = vrot.slane %v352_v33, 2  ;;  %v330_v45 = vadd.f32 %v329_v35, %v328_v25  ;;  %v450_v10 = vld [vmem:[#allocation8 + $0x48] sm:$0xff]  ;;  %v449_v17 = vld [vmem:[#allocation8 + $0x40] sm:$0xff]  ;;  %v374_v20 = vld [vmem:[#allocation6 + $0x18] sm:$0xff]  ;;  %s436_s14 = sadd.f32 1e-16, %s435_s16 }
  0x3b   : > { %v336_v46 = vadd.f32 %v335_v36, %v334_v26  ;;  %v342_v47 = vadd.f32 %v341_v37, %v340_v27  ;;  %v359_v48 = vrot.slane %v358_v38, 2  ;;  %459 = vmatpush.msra.mxu1 %v454_v34  ;;  %v348_v52 = vadd.f32 %v347_v42, %v346_v32  ;;  %v448_v23 = vld [vmem:[#allocation8 + $0x38] sm:$0xff]  ;;  %v373_v25 = vld [vmem:[#allocation6 + $0x10] sm:$0xff]  ;;  %v446_v31 = vld [vmem:[#allocation8 + $0x28] sm:$0xff]  ;;  %s517_s15 = sshll.u32 %s305_s21, 4  ;;  %s519_s8 = sshll.u32 %s515_s30, 4  ;;  %s518_s15 = int_to_ptr.vmem [resolvable:$true] %s517_s15  ;;  %s520_s8 = int_to_ptr.hbm [resolvable:$true] %s519_s8 }
  0x3c   : > { %419 = vmatpush.msra.mxu0 %v381_v18  ;;  %v319_v50 = vrot.slane %v318_v40, 1  ;;  %v325_v51 = vrot.slane %v324_v41, 1  ;;  %v354_v53 = vadd.f32 %v353_v43, %v352_v33  ;;  %v331_v55 = vrot.slane %v330_v45, 1  ;;  %v447_v27 = vld [vmem:[#allocation8 + $0x30] sm:$0xff]  ;;  %v371_v32 = vld [vmem:[#allocation6] sm:$0xff]  ;;  %v444_v35 = vld [vmem:[#allocation8 + $0x18] sm:$0xff]  ;;  %s437_s20 = smul.f32 %s436_s14, %s436_s14 }
  0x3d   : > { %v337_v56 = vrot.slane %v336_v46, 1  ;;  %v343_v57 = vrot.slane %v342_v47, 1  ;;  %v360_v58 = vadd.f32 %v359_v48, %v358_v38  ;;  %460 = vmatpush.msra.mxu1 %v453_v44  ;;  %v349_v62 = vrot.slane %v348_v52, 1  ;;  %v445_v34 = vld [vmem:[#allocation8 + $0x20] sm:$0xff]  ;;  %v443_v36 = vld [vmem:[#allocation8 + $0x10] sm:$0xff]  ;;  %v442_v37 = vld [vmem:[#allocation8 + $0x8] sm:$0xff] }
  0x3e   : > { %420 = vmatpush.msra.mxu0 %v380_v29  ;;  %v320_v60 = vadd.f32 %v319_v50, %v318_v40  ;;  %v326_v61 = vadd.f32 %v325_v51, %v324_v41  ;;  %v355_v63 = vrot.slane %v354_v53, 1  ;;  %v332_v1 = vadd.f32 %v331_v55, %v330_v45  ;;  %v372_v29 = vld [vmem:[#allocation6 + $0x8] sm:$0xff]  ;;  %v441_v38 = vld [vmem:[#allocation8] sm:$0xff]  ;;  %s505_s28 = scalar_lea.sflag [#allocation5], %s1015_s13  ;;  %s810_s9 = sshra.s32 %s520_s8, 4  ;;  %s811_s9 = int_to_ptr.hbm [resolvable:$true] %s810_s9 }
  0x3f   : > { %v338_v2 = vadd.f32 %v337_v56, %v336_v46  ;;  %v344_v3 = vadd.f32 %v343_v57, %v342_v47  ;;  %v361_v4 = vrot.slane %v360_v58, 1  ;;  %461 = vmatpush.msra.mxu1 %v452_v54  ;;  %v350_v6 = vadd.f32 %v349_v62, %v348_v52  ;;  %v697_v44 = vld [vmem:[%s1073_s4] ss:$0 sm:$0xff]  ;;  %s812_s5 = scalar_lea.hbm %s811_s9, 8  ;;  %s816_s17 = scalar_lea.hbm %s1075_s6, 16 }
  0x40   : > { %421 = vmatpush.msra.mxu0 %v379_v39  ;;  %v356_v7 = vadd.f32 %v355_v63, %v354_v53  ;;  %v363_v8 = vmul.f32 0.125, %v320_v60  ;;  %v364_v9 = vmul.f32 0.125, %v326_v61  ;;  %v365_v11 = vmul.f32 0.125, %v332_v1  ;;  %v696_v39 = vld [vmem:[%s1071_s2] ss:$0 sm:$0xff]  ;;  %p813_p1 = scmp.ne.s32.totalorder %s811_s9, %s812_s5  ;;  %p817_p11 = scmp.lt.s32.totalorder %s811_s9, %s1075_s6 }
  0x41   : > { %v366_v12 = vmul.f32 0.125, %v338_v2  ;;  %v367_v13 = vmul.f32 0.125, %v344_v3  ;;  %462 = vmatpush.msra.mxu1 %v451_v0  ;;  %v368_v15 = vmul.f32 0.125, %v350_v6  ;;  %v362_v18 = vadd.f32 %v361_v4, %v360_v58  ;;  %p818_p2 = scmp.lt.s32.totalorder %s816_s17, %s812_s5 }
  0x42   : > { %422 = vmatpush.msra.mxu0 %v378_v49  ;;  %v400_v16 = vsel %vm399_vm0, %v364_v9, %v363_v8  ;;  %v369_v21 = vmul.f32 0.125, %v356_v7  ;;  %v485_v50 = vstv %s437_s20  ;;  %v487_v55 = vlaneseq  ;;  %p814_p4 = pnand %p813_p1, %p982_p3 }
  0x43   : > { %v402_v19 = vsel %vm401_vm1, %v365_v11, %v400_v16  ;;  %463 = vmatpush.msra.mxu1 %v450_v10  ;;  %v370_v28 = vmul.f32 0.125, %v362_v18  ;;  %p819_p9 = por %p818_p2, %p817_p11 }
  0x44   : > { %423 = vmatpush.msra.mxu0 %v377_v59  ;;  %v404_v22 = vsel %vm403_vm2, %v366_v12, %v402_v19  ;;  %v488_v58 = vand.u32 127, %v487_v55  ;;  %p815_p8 = pneg %p814_p4 }
  0x45   : > { %v406_v24 = vsel %vm405_vm3, %v367_v13, %v404_v22  ;;  %464 = vmatpush.msra.mxu1 %v449_v17 }
  0x46   : > { %424 = vmatpush.msra.mxu0 %v376_v5  ;;  %v408_v26 = vsel %vm407_vm4, %v368_v15, %v406_v24  ;;  %vm489_vm7 = vcmp.lt.s32.totalorder %v488_v58, 4  ;;  %p820_p10 = pnand %p819_p9, %p815_p8 }
  0x47   : > { %465 = vmatpush.msra.mxu1 %v448_v23  ;;  %v410_v30 = vsel %vm409_vm5, %v369_v21, %v408_v26 }
  0x48   : > { %425 = vmatpush.msra.mxu0 %v375_v14  ;;  %v412_v33 = vsel %vm411_vm6, %v370_v28, %v410_v30 }
  0x49   : > { %466 = vmatpush.msra.mxu1 %v447_v27 }
  0x4a   : > { %426 = vmatpush.msra.mxu0 %v374_v20 }
  0x4b   : > { %467 = vmatpush.msra.mxu1 %v446_v31 }
  0x4c   : > { %427 = vmatpush.msra.mxu0 %v373_v25 }
  0x4d   : > { %468 = vmatpush.msra.mxu1 %v445_v34 }
  0x4e   : > { %428 = vmatpush.msra.mxu0 %v372_v29 }
  0x4f   : > { %469 = vmatpush.msra.mxu1 %v444_v35 }
  0x50   : > { %429 = vmatpush.msra.mxu0 %v371_v32 }
  0x51   : > { %430 = vmatmul.f32.vlgmr.msra.gmra.mxu0 %v412_v33  ;;  %470 = vmatpush.msra.mxu1 %v443_v36 }
  0x53   : > { %471 = vmatpush.msra.mxu1 %v442_v37 }
  0x55   : > { %472 = vmatpush.msra.mxu1 %v441_v38 }
  0xce   : > { %v431_v40 = vpop.f32.mrf.mxu0 }
  0xcf   : > { %v432_v41 = vadd.f32 %v696_v39, %v431_v40 }
  0xd1   : > { %698 = vtanh.f32 %v432_v41 }
  0xd7   : > { %v699_v42 = vpop.eup %698 }
  0xd8   : > { %473 = vmatmul.f32.vlgmr.msra.gmra.mxu1 %v699_v42  ;;  %v438_v43 = vmul.f32 %v699_v42, %v699_v42 }
  0xda   : > { %439 = vadd.xlane.f32.xlu0 %v438_v43 }
 0x14d   : > { %v440_v45 = vpop.xlane.xlu0 %439 }
 0x14e   : > { %v481_v47 = vadd.f32 %v697_v44, %v440_v45 }
 0x155   : > { %v474_v46 = vpop.f32.mrf.mxu1 }
 0x156   : > { %v482_v48 = vmul.f32 2.0, %v474_v46 }
 0x158   : > { %v483_v49 = vsub.f32 %v481_v47, %v482_v48 }
 0x15a   : > { %v484_v51 = vmax.f32 %v483_v49, 0.0 }
 0x15c   : > { %v486_v52 = vmul.f32 %v485_v50, %v484_v51 }
 0x15e   : > { %v490_v53 = vsub.f32 0.0, %v486_v52 }
 0x160   : > { %v491_v54 = vmul.f32 1.442695, %v490_v53 }
 0x162   : > { %700 = vpow2.f32 %v491_v54 }
 0x168   : > { %v701_v56 = vpop.eup %700 }
 0x169   : > { %v493_v57 = vmul.f32 1.442695, %v701_v56 }
 0x16b   : > { %702 = vpow2.f32 %v493_v57 }
 0x171   : > { %v703_v59 = vpop.eup %702 }
 0x172   : > { %v495_v60 = vsel %vm489_vm7, %v703_v59, 0.0 }
 0x173   : > { %496 = vadd.xlane.f32.xlu0 %v495_v60 }
 0x1e6   : > { %v497_v61 = vpop.xlane.xlu0 %496 }
 0x1e7   : > { %704 = vrcp.f32 %v497_v61 }
 0x1ed   : > { %v705_v62 = vpop.eup %704 }
 0x1ee   : > { %v499_v63 = vmul.f32 %v705_v62, %v497_v61 }
 0x1f0   : > { %v500_v0 = vsub.f32 2.0, %v499_v63 }
 0x1f2   : > { %v501_v1 = vmul.f32 %v705_v62, %v500_v0 }
 0x1f4   : > { %v502_v2 = vmul.f32 %v501_v1, %v495_v60 }
 0x1f6   : > { %503 = vst [vmem:[%s305_s21] sm:$0xff] %v502_v2 }
 0x1f7   : > { %823 = shalt.err (!%p820_p10)
}
 0x1f8   : > { %637 = dma.vmem_to_hbm [thread:$0]  (%p982_p3), %s518_s15, 128, %s520_s8, %s505_s28  }
 0x1f9 PF: > { %s531_s13 = sand.u32 1, %s854_s23   ;;  %p1083_p12 = scmp.ge.s32.totalorder %s866_s26, 2 }
 0x1fa   : > { %s532_s7 = scalar_lea.sflag [#allocation5], %s531_s13 }
 0x1fb   : > { %p651_p13 = pnand %p1083_p12, %p945_p6 }
 0x1fd   : > { %p652_p0 = pneg %p651_p13 }
 0x1ff   : > { %849 = dma.done.wait (%p652_p0), %s532_s7, 128  }
 0x200   : > { %851 = vsyncadd (%p652_p0), %s532_s7, 4294967168  ;;  %p21_p5 = scmp.ge.s32.totalorder %s972_s19, 4   ;;  %s1084_s23 = smov %s858_s24 }
 0x201   : > { %s1085_s24 = smov %s862_s25  ;;  %s1086_s25 = smov %s988_s27 }
 0x202   : > { %s1087_s26 = smov %s972_s19  ;;  %23 = sbr.rel (!%p21_p5) target bundleno = 8 (0x8), region = 97 }
 0x207   :  { %538 = vsyncpa [#allocation4], 1 }
 0x208   :  { %540 = vsyncpa [#allocation4 + $0x1], 1 }
 0x209   :  { %541 = vsyncpa [#allocation7], 1 }
 0x20a   :  { %542 = vsyncpa [#allocation5], 1 }
 0x20b   :  { %544 = vsyncpa [#allocation5 + $0x1], 1 }

</bundles_post_ra>
